<compile_context>
chip_gen: v7x
topology: tpu7x:2x2x1
jax: 0.10.0
libtpu: 0.0.40
codegen_flags: <defaults>
</compile_context>

<pallas_src>
import jax
import jax.numpy as jnp
from jax.experimental import pallas as pl
from jax.experimental.pallas import tpu as pltpu

EPS = 1e-12  # F.normalize default eps


def _make_kernel(scale: float, compute_dtype):
    f32 = jnp.float32

    def kernel(gamma_ref, beta_ref, x_ref, o_ref):
        # x block: (1, TN, Dp) -> (TN, Dp), native dtype
        x = x_ref[0]
        xf = x.astype(f32)
        # row-wise sum of squares in f32 (consumed by the reduce)
        ssq = jnp.sum(xf * xf, axis=-1, keepdims=True)                # (TN, 1)
        # rsqrt -> EUP; clamp at EPS^2 so denominator matches max(||x||, EPS);
        # sqrt(D) folded into the per-row scale.
        inv = jax.lax.rsqrt(jnp.maximum(ssq, EPS * EPS)) * scale      # (TN, 1) f32

        gamma = gamma_ref[0]                                          # (1, Dp)
        beta = beta_ref[0]                                            # (1, Dp)

        if compute_dtype == f32:
            # f32 inputs (and the only sensible path on v5e: no bf16 VALU)
            out = (xf * inv) * gamma.astype(f32) + beta.astype(f32)
        else:
            # bf16 scale/shift on v6e/v7x: halves elementwise work and the
            # full-tile temporaries; ssq reduction above stayed in f32.
            out = (x * inv.astype(compute_dtype)) * gamma + beta
        o_ref[0] = out.astype(o_ref.dtype)

    return kernel


def _vmem_capacity_bytes() -> int:
    try:
        return int(pltpu.get_tpu_info().vmem_capacity_bytes)
    except Exception:
        return 128 << 20  # conservative fallback (v5e/v6e physical)


def _choose_tn(N, D, itemsize, batch, budget_bytes=12 << 20):
    """Rows per tile, sized against total resident bytes per row.

    Resident per row ~= double-buffered in+out at native dtype (2*itemsize*2)
    plus ~8 B/elem of in-kernel f32 temporaries (upcast for ssq + f32 out).
    """
    pack = max(1, 4 // int(itemsize))     # sublane packing: f32=1, bf16=2, i8=4
    align = 8 * pack                      # 8 / 16 / 32 row alignment
    per_row = max(1, D * (2 * itemsize * 2 + 8))
    tn = min(int(budget_bytes // per_row), int(N))

    # v7x has 2 TCs: keep at least ceil(4/B) tiles along N so "parallel"
    # semantics has something to shard (skip when N is too tiny to matter).
    min_tiles = -(-4 // max(1, int(batch)))
    if min_tiles > 1:
        cap = -(-int(N) // min_tiles)
        cap = (cap // align) * align
        if cap >= align:
            tn = min(tn, cap)

    if tn < N:
        tn = max(align, (tn // align) * align)   # dtype-aware sublane alignment
    else:
        tn = int(N)                              # full extent is always legal
    return tn


def adaptive_rms_norm(x, cond, w_gamma, b_gamma, w_beta, b_beta):
    """x: (B, N, D); cond: (B, Cd); w_*: (Cd, D); b_*: (D,)."""
    B, N, D = x.shape
    scale = float(D) ** 0.5
    dtype = x.dtype
    itemsize = jnp.dtype(dtype).itemsize

    # Elementwise math dtype: bf16 on bf16 inputs (v6e/v7x bf16 VALU), else f32.
    compute_dtype = jnp.bfloat16 if dtype == jnp.bfloat16 else jnp.float32

    # Hoist the tiny adaptive Linears out of the kernel: one dense XLA matmul
    # each, computed once per call instead of once per N-tile on the MXU.
    gamma = (cond.astype(jnp.float32) @ w_gamma.astype(jnp.float32)
             + b_gamma.astype(jnp.float32))
    beta = (cond.astype(jnp.float32) @ w_beta.astype(jnp.float32)
            + b_beta.astype(jnp.float32))
    gamma = gamma.astype(compute_dtype).reshape(B, 1, D)
    beta = beta.astype(compute_dtype).reshape(B, 1, D)

    # Lane-dense last dim: pad D up to a multiple of 128 when needed (zeros do
    # not change ssq; padded gamma/beta cols are zero; pad sliced off below).
    # No-op (and no extra HBM pass) when D is already a multiple of 128.
    Dp = D if D % 128 == 0 else ((D + 127) // 128) * 128
    if Dp != D:
        pad = [(0, 0), (0, 0), (0, Dp - D)]
        x_k = jnp.pad(x, pad)
        gamma = jnp.pad(gamma, pad)
        beta = jnp.pad(beta, pad)
    else:
        x_k = x

    tn = _choose_tn(N, Dp, itemsize, B)
    n_tiles = pl.cdiv(N, tn)

    # ~75% of physical VMEM, capped at 64 MiB: 64 MiB on v5e/v6e (128 MiB
    # physical), ~48 MiB on v7x (64 MiB physical) so Mosaic keeps headroom.
    vmem_limit = int(min(64 << 20, (_vmem_capacity_bytes() * 3) // 4))

    cost = pl.CostEstimate(
        flops=6 * B * N * D,
        transcendentals=B * N,
        bytes_accessed=2 * B * N * D * itemsize
        + 2 * B * D * jnp.dtype(compute_dtype).itemsize,
    )

    out = pl.pallas_call(
        _make_kernel(scale, compute_dtype),
        out_shape=jax.ShapeDtypeStruct((B, N, Dp), dtype),
        grid_spec=pltpu.PrefetchScalarGridSpec(
            num_scalar_prefetch=0,
            grid=(B, n_tiles),
            in_specs=[
                pl.BlockSpec((1, 1, Dp), lambda b, n: (b, 0, 0)),    # gamma[b]
                pl.BlockSpec((1, 1, Dp), lambda b, n: (b, 0, 0)),    # beta[b]
                pl.BlockSpec((1, tn, Dp), lambda b, n: (b, n, 0)),   # x tile
            ],
            out_specs=pl.BlockSpec((1, tn, Dp), lambda b, n: (b, n, 0)),
        ),
        compiler_params=pltpu.CompilerParams(
            dimension_semantics=("parallel", "parallel"),
            vmem_limit_bytes=vmem_limit,
        ),
        cost_estimate=cost,
    )(gamma, beta, x_k)

    if Dp != D:
        out = out[..., :D]
    return out


def reference(x, cond, w_gamma, b_gamma, w_beta, b_beta):
    D = x.shape[-1]
    norm = jnp.sqrt(jnp.sum(x * x, axis=-1, keepdims=True))
    normed = x / jnp.maximum(norm, EPS) * (D ** 0.5)
    gamma = cond @ w_gamma + b_gamma
    beta = cond @ w_beta + b_beta
    return normed * gamma[:, None, :] + beta[:, None, :]


if __name__ == "__main__":
    B, N, D = 2, 8, 32
    Cd = D  # cond_dim defaults to dim

    key = jax.random.PRNGKey(0)
    kx, kc, kwg, kwb = jax.random.split(key, 4)

    x = jax.random.normal(kx, (B, N, D), dtype=jnp.float32)
    cond = jax.random.normal(kc, (B, Cd), dtype=jnp.float32)

    # Parameters (module __init__ shapes: Linear(cond_dim, dim) for gamma/beta).
    # Small random weights exercise the adaptive path; the module's own init
    # would be zeros(weight), ones/zeros(bias).
    w_gamma = 0.02 * jax.random.normal(kwg, (Cd, D), dtype=jnp.float32)
    b_gamma = jnp.ones((D,), dtype=jnp.float32)
    w_beta = 0.02 * jax.random.normal(kwb, (Cd, D), dtype=jnp.float32)
    b_beta = jnp.zeros((D,), dtype=jnp.float32)

    out = adaptive_rms_norm(x, cond, w_gamma, b_gamma, w_beta, b_beta)
    out = jax.block_until_ready(out)

    ref = reference(x, cond, w_gamma, b_gamma, w_beta, b_beta)
    assert out.shape == (B, N, D)
    assert jnp.allclose(out, ref, atol=1e-4, rtol=1e-5), "mismatch vs reference"

    print("KERNEL_OK")
</pallas_src>

<mosaic_0001>
module attributes {stable_mosaic.version = 11 : i64} {
  func.func @kernel(%arg0: i32, %arg1: i32, %arg2: memref<1x1x128xf32, #tpu.memory_space<vmem>>, %arg3: memref<1x1x128xf32, #tpu.memory_space<vmem>>, %arg4: memref<1x8x128xf32, #tpu.memory_space<vmem>>, %arg5: memref<1x8x128xf32, #tpu.memory_space<vmem>>) attributes {dimension_semantics = [#tpu.dimension_semantics<parallel>, #tpu.dimension_semantics<parallel>], iteration_bounds = array<i64: 2, 1>, scalar_prefetch = 0 : i64, scratch_operands = 0 : i64, tpu.core_type = #tpu.core_type<tc>, window_params = [{transform_indices = @transform_0, window_bounds = array<i64: 1, 1, 128>}, {transform_indices = @transform_1, window_bounds = array<i64: 1, 1, 128>}, {transform_indices = @transform_2, window_bounds = array<i64: 1, 8, 128>}, {transform_indices = @transform_3, window_bounds = array<i64: 1, 8, 128>}]} {
    %c0 = arith.constant 0 : index
    %c0_0 = arith.constant 0 : index
    %c0_1 = arith.constant 0 : index
    %0 = vector.load %arg4[%c0, %c0_0, %c0_1] : memref<1x8x128xf32, #tpu.memory_space<vmem>>, vector<1x8x128xf32>
    %1 = vector.shape_cast %0 : vector<1x8x128xf32> to vector<8x128xf32>
    %2 = arith.mulf %1, %1 : vector<8x128xf32>
    %cst = arith.constant dense<0.000000e+00> : vector<8xf32>
    %3 = vector.multi_reduction <add>, %2, %cst [1] : vector<8x128xf32> to vector<8xf32>
    %4 = vector.shape_cast %3 : vector<8xf32> to vector<8x1xf32>
    %cst_2 = arith.constant 1.000000e-24 : f32
    %5 = vector.broadcast %cst_2 : f32 to vector<8x1xf32>
    %6 = arith.maximumf %4, %5 : vector<8x1xf32>
    %7 = math.rsqrt %6 : vector<8x1xf32>
    %cst_3 = arith.constant 5.65685415 : f32
    %8 = vector.broadcast %cst_3 : f32 to vector<8x1xf32>
    %9 = arith.mulf %7, %8 : vector<8x1xf32>
    %c0_4 = arith.constant 0 : index
    %c0_5 = arith.constant 0 : index
    %c0_6 = arith.constant 0 : index
    %10 = vector.load %arg2[%c0_4, %c0_5, %c0_6] : memref<1x1x128xf32, #tpu.memory_space<vmem>>, vector<1x1x128xf32>
    %11 = vector.shape_cast %10 : vector<1x1x128xf32> to vector<1x128xf32>
    %c0_7 = arith.constant 0 : index
    %c0_8 = arith.constant 0 : index
    %c0_9 = arith.constant 0 : index
    %12 = vector.load %arg3[%c0_7, %c0_8, %c0_9] : memref<1x1x128xf32, #tpu.memory_space<vmem>>, vector<1x1x128xf32>
    %13 = vector.shape_cast %12 : vector<1x1x128xf32> to vector<1x128xf32>
    %14 = vector.broadcast %9 : vector<8x1xf32> to vector<8x128xf32>
    %15 = arith.mulf %1, %14 : vector<8x128xf32>
    %16 = vector.broadcast %11 : vector<1x128xf32> to vector<8x128xf32>
    %17 = arith.mulf %15, %16 : vector<8x128xf32>
    %18 = vector.broadcast %13 : vector<1x128xf32> to vector<8x128xf32>
    %19 = arith.addf %17, %18 : vector<8x128xf32>
    %c0_10 = arith.constant 0 : index
    %c0_11 = arith.constant 0 : index
    %c0_12 = arith.constant 0 : index
    %20 = vector.load %arg5[%c0_10, %c0_11, %c0_12] : memref<1x8x128xf32, #tpu.memory_space<vmem>>, vector<1x8x128xf32>
    %21 = vector.shape_cast %20 : vector<1x8x128xf32> to vector<8x128xf32>
    %22 = vector.shape_cast %19 : vector<8x128xf32> to vector<1x8x128xf32>
    tpu.vector_store %arg5[%c0_10, %c0_11, %c0_12], %22 {strides = array<i32>} : memref<1x8x128xf32, #tpu.memory_space<vmem>>, vector<1x8x128xf32>,
    return
  }
  func.func @transform_0(%arg0: i32, %arg1: i32) -> (i32, i32, i32) {
    %c0_i32 = arith.constant 0 : i32
    %c0_i32_0 = arith.constant 0 : i32
    %c0_i32_1 = arith.constant 0 : i32
    return %arg0, %c0_i32, %c0_i32_0 : i32, i32, i32
  }
  func.func @transform_1(%arg0: i32, %arg1: i32) -> (i32, i32, i32) {
    %c0_i32 = arith.constant 0 : i32
    %c0_i32_0 = arith.constant 0 : i32
    %c0_i32_1 = arith.constant 0 : i32
    return %arg0, %c0_i32, %c0_i32_0 : i32, i32, i32
  }
  func.func @transform_2(%arg0: i32, %arg1: i32) -> (i32, i32, i32) {
    %c0_i32 = arith.constant 0 : i32
    %c0_i32_0 = arith.constant 0 : i32
    return %arg0, %arg1, %c0_i32 : i32, i32, i32
  }
  func.func @transform_3(%arg0: i32, %arg1: i32) -> (i32, i32, i32) {
    %c0_i32 = arith.constant 0 : i32
    %c0_i32_0 = arith.constant 0 : i32
    return %arg0, %arg1, %c0_i32 : i32, i32, i32
  }
}

</mosaic_0001>

<bundles_post_ra>
// kernel: tpu_custom_call.1
= control target key start
LH: loop header
LB: loop body
LE: loop exit
PB: predicated region body
PF: predicated region fallthrough
CT: control target
= control target key end

     0   :  { %s975_s0 = inlined_call_operand.hbm [shape: f32[2,1,128], index: 0, kind: input, shape index: {}]   ;;  %s976_s1 = inlined_call_operand.hbm [shape: f32[2,1,128], index: 1, kind: input, shape index: {}]   ;;  %s977_s2 = inlined_call_operand.hbm [shape: f32[2,8,128], index: 2, kind: input, shape index: {}]   ;;  %s978_s3 = inlined_call_operand.hbm [shape: f32[2,8,128], index: 3, kind: output, shape index: {}]  }
   0x1   :  { %982 = sst [smem:[#allocation12_spill]] %s976_s1 }
   0x2   :  { %8 = vsyncpa [#allocation3], 0 }
   0x3   :  { %10 = vsyncpa [#allocation3 + $0x1], 0 }
   0x4   :  { %11 = vsyncpa [#allocation6], 0 }
   0x5   :  { %13 = vsyncpa [#allocation6 + $0x1], 0 }
   0x6   :  { %14 = vsyncpa [#allocation4], 0 }
   0x7   :  { %16 = vsyncpa [#allocation4 + $0x1], 0  ;;  %s718_s12 = smov 0   ;;  %s720_s13 = smov 0  }
   0x8   :  { %s722_s14 = smov 0   ;;  %s724_s15 = smov 0  }
   0x9   :  { %s726_s16 = smov 0   ;;  %s728_s17 = smov 0  }
   0xa LB: > { %s749_s18 = sadd.s32 4294967295, %s692_s17   ;;  %s426_s19 = sadd.s32 4294967294, %s692_s17   ;;  %s692_s17 = sphi %s728_s17, %s22_s17   ;;  %s688_s16 = sphi %s726_s16, %s1002_s16   ;;  %s684_s15 = sphi %s724_s15, %s1001_s15   ;;  %s680_s14 = sphi %s722_s14, %s1000_s14   ;;  %s676_s13 = sphi %s720_s13, %s999_s13   ;;  %s672_s12 = sphi %s718_s12, %s998_s12  }
   0xb   : > { %s34_s20 = sadd.s32 1, %s688_s16  ;;  %s41_s21 = sadd.s32 1, %s680_s14 }
   0xc   : > { %p36_p0 = scmp.ge.s32.totalorder %s34_s20, 2  ;;  %p48_p1 = scmp.ne.s32.totalorder %s680_s14, %s676_s13 }
   0xd   : > { %p49_p2 = scmp.eq.s32.totalorder %s692_s17, 0  ;;  %p54_p3 = scmp.ne.s32.totalorder %s676_s13, %s672_s12 }
   0xe   : > { %s1004_s20 = smov (%p36_p0, %s34_s20), 0  ;;  %p55_p5 = scmp.eq.s32.totalorder %s749_s18, 0 }
   0xf   : > { %p761_p4 = por %p49_p2, %p48_p1  ;;  %s38_s23 = ssub.s32 %s688_s16, %s1004_s20 }
  0x10   : > { %p134_p6 = scmp.eq.s32.totalorder %s749_s18, 1  ;;  %p39_p7 = scmp.eq.s32.totalorder %s38_s23, 0 }
  0x11   : > { %p769_p8 = por %p55_p5, %p54_p3  ;;  %p140_p10 = scmp.eq.s32.totalorder %s426_s19, 1 }
  0x12   : > { %p773_p9 = por %p134_p6, %p48_p1  ;;  %p464_p13 = scmp.lt.s32.totalorder %s692_s17, 2 }
  0x13   : > { %s984_s24 = scalar_select %p769_p8, 1, 0 }
  0x14   : > { %s985_s25 = scalar_select %p773_p9, 1, 0 }
  0x15   : > { %s778_s26 = scalar_select %p39_p7, %s680_s14, %s41_s21  }
  0x16   : > { %p780_p11 = por %p140_p10, %p54_p3  ;;  %s787_s28 = sand.u32 1, %s680_s14  }
  0x17   : > { %s429_s29 = sshll.u32 %s688_s16, 4  ;;  %s177_s30 = sand.u32 1, %s692_s17  }
  0x18   : > { %s986_s27 = scalar_select %p780_p11, 1, 0 }
  0x19   : > { %p793_p0 = pnand %p464_p13, %p761_p4  ;;  %s988_s1 = sld [smem:[#allocation12_spill]] }
  0x1a   : > { %s180_s8 = scalar_lea.vmem [#allocation5], %s787_s28  ;;  %s808_s10 = scalar_lea.sflag [#allocation6], %s177_s30 }
  0x1b   : > { %s987_s4 = scalar_select %p793_p0, 1, 0 }
  0x1c   : > { %s187_s9 = sshll.u32 %s180_s8, 4  ;;  %p814_p3 = pneg %p793_p0  ;;  %s805_s9 = int_to_ptr.vmem [resolvable:$true] %s187_s9 }
  0x1f   : > { %s802_s7 = scalar_lea.hbm %s988_s1, %s429_s29  ;;  %s521_s23 = scalar_lea.hbm %s988_s1, 32 }
  0x20   : > { %s516_s11 = scalar_lea.hbm %s802_s7, 16  ;;  %p522_p6 = scmp.lt.u32.totalorder %s802_s7, %s988_s1 }
  0x21   : > { %p517_p2 = scmp.ne.s32.totalorder %s802_s7, %s516_s11  ;;  %p523_p7 = scmp.lt.u32.totalorder %s521_s23, %s516_s11 }
  0x22   : > { %p525_p13 = scmp.lt.u32.totalorder %s516_s11, %s802_s7 }
  0x23   : > { %p519_p4 = pnand %p814_p3, %p517_p2  ;;  %p524_p10 = por %p523_p7, %p522_p6 }
  0x25   : > { %p520_p5 = pneg %p519_p4  ;;  %p526_p12 = por %p525_p13, %p524_p10 }
  0x27   : > { %p527_p1 = pnand %p526_p12, %p520_p5 }
  0x29   : > { %530 = shalt.err (!%p527_p1)
}
  0x2a   : > { %s531_s30 = scalar_lea.vmem %s805_s9, 16  ;;  %s694_s8 = smov [#allocation5]  }
  0x2b   : > { %p532_p2 = scmp.ne.s32.totalorder %s805_s9, %s531_s30  ;;  %s536_s21 = sshll.u32 %s694_s8, 4  ;;  %s537_s21 = int_to_ptr.vmem [resolvable:$false] %s536_s21 }
  0x2c   : > { %s538_s22 = scalar_lea.vmem %s537_s21, 32  ;;  %p539_p9 = scmp.lt.s32.totalorder %s805_s9, %s537_s21 }
  0x2d   : > { %p534_p4 = pnand %p532_p2, %p814_p3  ;;  %p540_p8 = scmp.lt.s32.totalorder %s538_s22, %s531_s30 }
  0x2f   : > { %p535_p11 = pneg %p534_p4  ;;  %p541_p6 = por %p540_p8, %p539_p9 }
  0x31   : > { %p542_p7 = pnand %p541_p6, %p535_p11 }
  0x33   : > { %545 = shalt.err (!%p542_p7)
}
  0x34   : > { %456 = dma.hbm_to_vmem [thread:$0]  (!%p793_p0), %s802_s7, 16, %s805_s9, %s808_s10  }
  0x35   : > { %p211_p12 = scmp.lt.s32.totalorder %s692_s17, 3  ;;  %p990_p1 = scmp.ge.s32.totalorder %s692_s17, 1 }
  0x36   : > { %s850_s6 = scalar_lea.hbm %s975_s0, %s429_s29  ;;  %s163_s30 = scalar_lea.vmem [#allocation2], %s787_s28 }
  0x37   : > { %p841_p5 = pnand %p990_p1, %p211_p12  ;;  %s170_s8 = sshll.u32 %s163_s30, 4  ;;  %s853_s8 = int_to_ptr.vmem [resolvable:$true] %s170_s8 }
  0x38   : > { %s431_s7 = sshll.u32 %s787_s28, 3  ;;  %s161_s9 = scalar_lea.sflag [#allocation3], %s787_s28 }
  0x39   : > { %s991_s11 = scalar_select %p841_p5, 1, 0 }
  0x3a   : > { %s546_s21 = scalar_lea.hbm %s850_s6, 16  ;;  %s551_s29 = scalar_lea.hbm %s975_s0, 32 }
  0x3b   : > { %p547_p8 = scmp.ne.s32.totalorder %s850_s6, %s546_s21  ;;  %p552_p10 = scmp.lt.u32.totalorder %s850_s6, %s975_s0 }
  0x3c   : > { %p553_p13 = scmp.lt.u32.totalorder %s551_s29, %s546_s21  ;;  %p555_p4 = scmp.lt.u32.totalorder %s546_s21, %s850_s6 }
  0x3d   : > { %p549_p9 = pnand %p547_p8, %p814_p3 }
  0x3e   : > { %p554_p2 = por %p553_p13, %p552_p10 }
  0x3f   : > { %p550_p11 = pneg %p549_p9 }
  0x40   : > { %p556_p6 = por %p555_p4, %p554_p2 }
  0x42   : > { %p557_p7 = pnand %p556_p6, %p550_p11 }
  0x44   : > { %560 = shalt.err (!%p557_p7)
}
  0x45   : > { %s561_s30 = scalar_lea.vmem %s853_s8, 16  ;;  %s695_s1 = smov [#allocation2]  }
  0x46   : > { %p562_p12 = scmp.ne.s32.totalorder %s853_s8, %s561_s30  ;;  %s566_s22 = sshll.u32 %s695_s1, 4  ;;  %s567_s22 = int_to_ptr.vmem [resolvable:$false] %s566_s22 }
  0x47   : > { %s568_s23 = scalar_lea.vmem %s567_s22, 32  ;;  %p569_p9 = scmp.lt.s32.totalorder %s853_s8, %s567_s22 }
  0x48   : > { %p564_p1 = pnand %p562_p12, %p814_p3  ;;  %p570_p5 = scmp.lt.s32.totalorder %s568_s23, %s561_s30 }
  0x4a   : > { %p565_p8 = pneg %p564_p1  ;;  %p571_p10 = por %p570_p5, %p569_p9 }
  0x4c   : > { %p572_p13 = pnand %p571_p10, %p565_p8 }
  0x4e   : > { %575 = shalt.err (!%p572_p13)
}
  0x4f   : > { %453 = dma.hbm_to_vmem [thread:$0]  (!%p793_p0), %s850_s6, 16, %s853_s8, %s161_s9  }
  0x50   : > { %s432_s21 = sshll.u32 %s688_s16, 7  ;;  %s198_s30 = scalar_lea.vmem [#allocation7], %s431_s7 }
  0x51   : > { %s882_s1 = scalar_lea.hbm %s977_s2, %s432_s21  ;;  %s206_s22 = sshll.u32 %s198_s30, 4  ;;  %s207_s22 = int_to_ptr.vmem [resolvable:$true] %s206_s22 }
  0x52   : > { %s576_s23 = scalar_lea.hbm %s882_s1, 128  ;;  %s581_s9 = scalar_lea.hbm %s977_s2, 256 }
  0x53   : > { %p577_p5 = scmp.ne.s32.totalorder %s882_s1, %s576_s23  ;;  %p582_p4 = scmp.lt.u32.totalorder %s882_s1, %s977_s2 }
  0x54   : > { %p583_p6 = scmp.lt.u32.totalorder %s581_s9, %s576_s23  ;;  %p585_p12 = scmp.lt.u32.totalorder %s576_s23, %s882_s1 }
  0x55   : > { %p579_p11 = pnand %p577_p5, %p814_p3 }
  0x56   : > { %p584_p7 = por %p583_p6, %p582_p4 }
  0x57   : > { %p580_p2 = pneg %p579_p11 }
  0x58   : > { %p586_p1 = por %p585_p12, %p584_p7 }
  0x5a   : > { %p587_p8 = pnand %p586_p1, %p580_p2 }
  0x5c   : > { %590 = shalt.err (!%p587_p8)
}
  0x5d   : > { %s591_s28 = scalar_lea.vmem %s207_s22, 128  ;;  %s696_s7 = smov [#allocation7]  }
  0x5e   : > { %p592_p9 = scmp.ne.s32.totalorder %s207_s22, %s591_s28  ;;  %s596_s5 = sshll.u32 %s696_s7, 4  ;;  %s597_s5 = int_to_ptr.vmem [resolvable:$false] %s596_s5 }
  0x5f   : > { %s598_s30 = scalar_lea.vmem %s597_s5, 256  ;;  %p599_p5 = scmp.lt.s32.totalorder %s207_s22, %s597_s5 }
  0x60   : > { %p594_p10 = pnand %p592_p9, %p814_p3  ;;  %p600_p11 = scmp.lt.s32.totalorder %s598_s30, %s591_s28 }
  0x62   : > { %p595_p13 = pneg %p594_p10  ;;  %p601_p0 = por %p600_p11, %p599_p5 }
  0x64   : > { %p602_p4 = pnand %p601_p0, %p595_p13 }
  0x66   : > { %605 = shalt.err (!%p602_p4)
}
  0x67   : > { %p992_p6 = scmp.ne.s32.totalorder %s987_s4, 0  ;;  %p993_p2 = scmp.ne.s32.totalorder %s991_s11, 0 }
  0x68   : > { %s907_s19 = sand.u32 (!%p993_p2), 1, %s676_s13   ;;  %p994_p3 = scmp.ne.s32.totalorder (!%p993_p2), %s984_s24, 0 }
  0x69   : > { %459 = dma.hbm_to_vmem [thread:$0]  (!%p992_p6), %s882_s1, 128, %s207_s22, %s808_s10  }
  0x6a   : > { %215 = sbr.rel (%p993_p2) target bundleno = 299 (0x12b), region = 32  ;;  %s218_s23 = scalar_lea.sflag (!%p993_p2), [#allocation3], %s907_s19 }
  0x6b   : > { %s220_s6 = scalar_lea.vmem (!%p993_p2), [#allocation2], %s907_s19 }
  0x71   : > { %659 = dma.done.wait (%p994_p3), %s218_s23, 16  }
  0x72   : > { %661 = vsyncadd (%p994_p3), %s218_s23, 4294967280  ;;  %s225_s4 = sand.u32 1, %s749_s18   ;;  %s228_s11 = scalar_lea.vmem [#allocation5], %s907_s19 }
  0x73   : > { %s226_s10 = scalar_lea.sflag [#allocation6], %s225_s4 }
  0x74   : > { %663 = dma.done.wait (%p994_p3), %s226_s10, 144  }
  0x75   : > { %665 = vsyncadd (%p994_p3), %s226_s10, 4294967152  ;;  %s434_s1 = sshll.u32 %s907_s19, 3  ;;  %v436_v6 = vld [vmem:[%s220_s6] ss:$0 sm:$0xff]  ;;  %s439_s24 = sshll.u32 %s684_s15, 7 }
  0x76   : > { %s237_s22 = scalar_lea.vmem [#allocation7], %s434_s1  ;;  %s267_s18 = scalar_lea.vmem [#allocation8], %s434_s1  ;;  %v437_v8 = vld [vmem:[%s228_s11] ss:$0 sm:$0xff] }
  0x77   : > { %v268_v0 = vld [vmem:[%s237_s22] sm:$0xff]  ;;  %s308_s8 = sshll.u32 %s267_s18, 4  ;;  %s928_s21 = scalar_lea.hbm %s978_s3, %s439_s24  ;;  %s923_s8 = int_to_ptr.vmem [resolvable:$true] %s308_s8 }
  0x78   : > { %v269_v1 = vmul.f32 %v268_v0, %v268_v0  ;;  %s294_s28 = scalar_lea.sflag [#allocation4], %s907_s19  ;;  %s606_s7 = scalar_lea.vmem %s923_s8, 128 }
  0x79   : > { %p607_p0 = scmp.ne.s32.totalorder %s923_s8, %s606_s7  ;;  %p995_p7 = scmp.ne.s32.totalorder %s985_s25, 0 }
  0x7a   : > { %270 = vadd.xlane.f32.xlu0 %v269_v1  ;;  %s697_s15 = smov [#allocation8]  }
  0x7b   : > { %p608_p12 = pnand %p607_p0, %p995_p7  ;;  %s610_s5 = sshll.u32 %s697_s15, 4  ;;  %s611_s5 = int_to_ptr.vmem [resolvable:$false] %s610_s5 }
  0x7c   : > { %s612_s30 = scalar_lea.vmem %s611_s5, 256  ;;  %p613_p8 = scmp.lt.s32.totalorder %s923_s8, %s611_s5 }
  0x7d   : > { %p609_p1 = pneg %p608_p12  ;;  %p614_p9 = scmp.lt.s32.totalorder %s612_s30, %s606_s7 }
  0x7f   : > { %p615_p10 = por %p614_p9, %p613_p8 }
  0x81   : > { %p616_p13 = pnand %p615_p10, %p609_p1 }
 0x107   : > { %v271_v2 = vpop.xlane.xlu0 %270 }
 0x108   : > { %v272_v3 = vmax.f32 %v271_v2, 1e-24 }
 0x10a   : > { %514 = vrsqrt.f32 %v272_v3 }
 0x114   : > { %v515_v4 = vpop.eup %514 }
 0x115   : > { %v274_v5 = vmul.f32 5.656854, %v515_v4 }
 0x117   : > { %v277_v7 = vmul.f32 %v274_v5, %v268_v0 }
 0x119   : > { %v284_v9 = vmul.f32 %v436_v6, %v277_v7 }
 0x11b   : > { %v291_v10 = vadd.f32 %v437_v8, %v284_v9 }
 0x11d   : > { %292 = vst [vmem:[%s267_s18] sm:$0xff] %v291_v10 }
 0x11e   : > { %619 = shalt.err (!%p616_p13)
}
 0x11f   : > { %s620_s19 = scalar_lea.hbm %s928_s21, 128  ;;  %s624_s4 = scalar_lea.hbm %s978_s3, 256 }
 0x120   : > { %p621_p5 = scmp.ne.s32.totalorder %s928_s21, %s620_s19  ;;  %p625_p6 = scmp.lt.u32.totalorder %s928_s21, %s978_s3 }
 0x121   : > { %p626_p2 = scmp.lt.u32.totalorder %s624_s4, %s620_s19  ;;  %p628_p0 = scmp.lt.u32.totalorder %s620_s19, %s928_s21 }
 0x122   : > { %p622_p11 = pnand %p621_p5, %p995_p7 }
 0x123   : > { %p627_p3 = por %p626_p2, %p625_p6 }
 0x124   : > { %p623_p4 = pneg %p622_p11 }
 0x125   : > { %p629_p12 = por %p628_p0, %p627_p3 }
 0x127   : > { %p630_p1 = pnand %p629_p12, %p623_p4 }
 0x129   : > { %633 = shalt.err (!%p630_p1)
}
 0x12a   : > { %448 = dma.vmem_to_hbm [thread:$0]  (%p995_p7), %s923_s8, 128, %s928_s21, %s294_s28  }
 0x12b PF: > { %s320_s1 = sand.u32 1, %s672_s12   ;;  %p996_p8 = scmp.ne.s32.totalorder %s986_s27, 0 }
 0x12c   : > { %p997_p9 = scmp.ge.s32.totalorder %s692_s17, 2  ;;  %s321_s22 = scalar_lea.sflag [#allocation4], %s320_s1 }
 0x12e   : > { %p461_p10 = pnand %p997_p9, %p996_p8 }
 0x130   : > { %667 = dma.done.wait (!%p461_p10), %s321_s22, 128  }
 0x131   : > { %669 = vsyncadd (!%p461_p10), %s321_s22, 4294967168  ;;  %s22_s17 = sadd.s32 1, %s692_s17   ;;  %s998_s12 = smov %s676_s13 }
 0x132   : > { %p19_p13 = scmp.ge.s32.totalorder %s22_s17, 4   ;;  %s999_s13 = smov %s680_s14 }
 0x133   : > { %s1000_s14 = smov %s778_s26  ;;  %s1001_s15 = smov %s688_s16 }
 0x134   : > { %s1002_s16 = smov %s1004_s20  ;;  %21 = sbr.rel (!%p19_p13) target bundleno = 10 (0xa), region = 101 }
 0x13b   :  { %326 = vsyncpa [#allocation3], 1 }
 0x13c   :  { %328 = vsyncpa [#allocation3 + $0x1], 1 }
 0x13d   :  { %329 = vsyncpa [#allocation6], 1 }
 0x13e   :  { %331 = vsyncpa [#allocation6 + $0x1], 1 }
 0x13f   :  { %332 = vsyncpa [#allocation4], 1 }
 0x140   :  { %334 = vsyncpa [#allocation4 + $0x1], 1 }

</bundles_post_ra>
